<compile_context>
chip_gen: v5e
topology: v5e:2x2
jax: 0.10.0
libtpu: 0.0.40
codegen_flags: <defaults>
</compile_context>

<pallas_src>
import numpy as np
import jax
import jax.numpy as jnp
from jax.experimental import pallas as pl
from jax.experimental.pallas import tpu as pltpu


# ---------------------------------------------------------------------------
# Pass A: channel compress (max & mean over C), tiled over (N, H-tiles).
# ---------------------------------------------------------------------------
def _compress_kernel(x_ref, comp_ref):
    # x_ref: (C, tH, W) block of x;  comp_ref: (2, tH, W) f32.
    c_total = x_ref.shape[0]
    x0 = x_ref[0].astype(jnp.float32)

    def body(c, carry):
        m_acc, s_acc = carry
        xc = x_ref[c].astype(jnp.float32)   # per-channel load: one vld sweep over C
        return jnp.maximum(m_acc, xc), s_acc + xc

    # Single fused sweep carrying both accumulators (max and sum) in f32;
    # inputs stay in their own dtype (bf16 stays bf16 on the load path).
    m_acc, s_acc = jax.lax.fori_loop(1, c_total, body, (x0, x0), unroll=True)
    comp_ref[0] = m_acc
    comp_ref[1] = s_acc * (1.0 / c_total)


# ---------------------------------------------------------------------------
# Pass B: 3x3 conv (2 -> 1 channels, SAME, no bias) + sigmoid on the padded
# compressed map.  comp_ref is (2, Hp, Wp) with zeros outside the real (H, W)
# region, so circular rolls pull in exactly the SAME-padding zero halo.
# ---------------------------------------------------------------------------
def _conv_gate_kernel(w_ref, comp_ref, scale_ref):
    hp, wp = scale_ref.shape
    maxc = comp_ref[0]
    meanc = comp_ref[1]
    # Hoist all 18 scalar weight reads (SMEM) out of the tap loop.
    wv = [w_ref[i] for i in range(18)]

    logit = jnp.zeros((hp, wp), jnp.float32)
    for dh in (-1, 0, 1):                      # row offset (kh - 1)
        if dh == 0:
            rmax, rmean = maxc, meanc
        else:
            rmax = pltpu.roll(maxc, (-dh) % hp, axis=0)
            rmean = pltpu.roll(meanc, (-dh) % hp, axis=0)
        for dw in (-1, 0, 1):                  # col offset (kw - 1)
            kh, kw = dh + 1, dw + 1
            w_max = wv[kh * 3 + kw]            # weight for max channel (in_ch 0)
            w_mean = wv[9 + kh * 3 + kw]       # weight for mean channel (in_ch 1)
            if dw == 0:
                smax, smean = rmax, rmean
            else:
                smax = pltpu.roll(rmax, (-dw) % wp, axis=1)
                smean = pltpu.roll(rmean, (-dw) % wp, axis=1)
            logit = logit + (w_max * smax + w_mean * smean)

    # exp() runs on the EUP; keep the divide exact so we stay within the 1e-5
    # parity check (pl.reciprocal(..., approx=True) would relax numerics and
    # this pass is tiny compared with pass C anyway).
    scale_ref[...] = 1.0 / (1.0 + jnp.exp(-logit))


# ---------------------------------------------------------------------------
# Pass C: lane-dense broadcast multiply  out = x * scale.
# ---------------------------------------------------------------------------
def _scale_mul_kernel(x_ref, s_ref, o_ref):
    # x_ref: (tC, H*W);  s_ref: (1, H*W) f32;  o_ref: (tC, H*W).
    # Keep the big tensor in its own dtype; only the small scale tile is cast.
    o_ref[...] = (x_ref[...] * s_ref[...].astype(x_ref.dtype)).astype(o_ref.dtype)


# ---------------------------------------------------------------------------
# Tiling / compiler-parameter helpers.
# ---------------------------------------------------------------------------
def _round_up(v, m):
    return ((v + m - 1) // m) * m


def _pick_h_tile(C, H, W, itemsize, budget=2 << 20):
    """Largest tH dividing H, multiple of 8 (or full H), with (C,tH,W) <= budget."""
    if C * H * W * itemsize <= budget or H % 8 != 0:
        return H
    best = 8
    for t in range(8, H + 1, 8):
        if H % t == 0 and C * t * W * itemsize <= budget:
            best = t
    return best


def _pick_c_tile(C, HW, itemsize, budget=2 << 20):
    """Largest tC dividing C, multiple of 8 (or full C), with (tC,H*W) <= budget."""
    if C * HW * itemsize <= budget or C % 8 != 0:
        return C
    best = 8
    for t in range(8, C + 1, 8):
        if C % t == 0 and t * HW * itemsize <= budget:
            best = t
    return best


def _params(dim_sem, block_bytes):
    # Explicit scoped-VMEM budget: double-buffered blocks + headroom, clamped
    # to a range that is safe on v5e / v6e / v7x.
    limit = int(min(max(2 * block_bytes + (4 << 20), 16 << 20), 64 << 20))
    return pltpu.CompilerParams(dimension_semantics=dim_sem,
                                vmem_limit_bytes=limit)


# ---------------------------------------------------------------------------
# Wrapper.
# ---------------------------------------------------------------------------
def spatial_attn(x, w):
    """x: (N, C, H, W);  w: (1, 2, 3, 3) conv weight (bias=False)."""
    N, C, H, W = x.shape
    HW = H * W
    itemsize = x.dtype.itemsize
    w_flat = w.reshape(-1).astype(jnp.float32)           # (18,) -> SMEM

    # ---- Pass A: compress (max & mean over C), tiled over H ----------------
    tH = _pick_h_tile(C, H, W, itemsize)
    blk_a = C * tH * W * itemsize + 2 * tH * W * 4
    comp = pl.pallas_call(
        _compress_kernel,
        out_shape=jax.ShapeDtypeStruct((N, 2, H, W), jnp.float32),
        grid=(N, H // tH),
        in_specs=[pl.BlockSpec((None, C, tH, W), lambda n, h: (n, 0, h, 0))],
        out_specs=pl.BlockSpec((None, 2, tH, W), lambda n, h: (n, 0, h, 0)),
        compiler_params=_params(("parallel", "parallel"), blk_a),
    )(x)

    # Zero-pad the (tiny) compressed map to an (8, 128)-aligned shape with at
    # least one extra row/col, so circular rolls wrap into zeros (= SAME halo).
    Hp = _round_up(H + 1, 8)
    Wp = _round_up(W + 1, 128)
    comp_p = jnp.pad(comp, ((0, 0), (0, 0), (0, Hp - H), (0, Wp - W)))

    # ---- Pass B: 3x3 conv + sigmoid -> spatial gate ------------------------
    blk_b = 2 * Hp * Wp * 4 + Hp * Wp * 4
    scale_p = pl.pallas_call(
        _conv_gate_kernel,
        out_shape=jax.ShapeDtypeStruct((N, Hp, Wp), jnp.float32),
        grid=(N,),
        in_specs=[
            pl.BlockSpec(memory_space=pltpu.MemorySpace.SMEM),        # weights
            pl.BlockSpec((None, 2, Hp, Wp), lambda n: (n, 0, 0, 0)),  # comp_p
        ],
        out_specs=pl.BlockSpec((None, Hp, Wp), lambda n: (n, 0, 0)),
        compiler_params=_params(("parallel",), blk_b),
    )(w_flat, comp_p)

    # ---- Pass C: lane-dense x * scale --------------------------------------
    tC = _pick_c_tile(C, HW, itemsize)
    x2 = x.reshape(N, C, HW)
    s2 = scale_p[:, :H, :W].reshape(N, 1, HW)
    blk_c = 2 * tC * HW * itemsize + HW * 4
    out = pl.pallas_call(
        _scale_mul_kernel,
        out_shape=jax.ShapeDtypeStruct((N, C, HW), x.dtype),
        grid=(N, C // tC),
        in_specs=[
            pl.BlockSpec((None, tC, HW), lambda n, c: (n, c, 0)),
            pl.BlockSpec((None, 1, HW), lambda n, c: (n, 0, 0)),
        ],
        out_specs=pl.BlockSpec((None, tC, HW), lambda n, c: (n, c, 0)),
        compiler_params=_params(("parallel", "parallel"), blk_c),
    )(x2, s2)
    return out.reshape(N, C, H, W)


# ---------------------------------------------------------------------------
# Plain-JAX reference matching the PyTorch forward.
# ---------------------------------------------------------------------------
def reference(x, w):
    xf = x.astype(jnp.float32)
    max_c = jnp.max(xf, axis=1, keepdims=True)
    mean_c = jnp.mean(xf, axis=1, keepdims=True)
    comp = jnp.concatenate([max_c, mean_c], axis=1)                  # (N,2,H,W)
    logit = jax.lax.conv_general_dilated(
        comp, w.astype(jnp.float32), window_strides=(1, 1), padding="SAME",
        dimension_numbers=("NCHW", "OIHW", "NCHW"))
    scale = jax.nn.sigmoid(logit)                                    # (N,1,H,W)
    return xf * scale


if __name__ == "__main__":
    key = jax.random.PRNGKey(0)
    kx, kw = jax.random.split(key)

    # Small shapes consistent with the module: NCHW input, 2->1 3x3 conv weight.
    x = jax.random.normal(kx, (2, 4, 16, 16), dtype=jnp.float32)
    w = 0.1 * jax.random.normal(kw, (1, 2, 3, 3), dtype=jnp.float32)

    out = jax.block_until_ready(spatial_attn(x, w))
    ref = jax.block_until_ready(reference(x, w))

    assert out.shape == x.shape and out.dtype == x.dtype
    assert np.allclose(np.asarray(out), np.asarray(ref), rtol=1e-5, atol=1e-5)

    print("KERNEL_OK")
</pallas_src>

<mosaic_0001>
module attributes {stable_mosaic.version = 11 : i64} {
  func.func @_compress_kernel(%arg0: i32, %arg1: i32, %arg2: memref<1x4x16x16xf32, #tpu.memory_space<vmem>>, %arg3: memref<1x2x16x16xf32, #tpu.memory_space<vmem>>) attributes {dimension_semantics = [#tpu.dimension_semantics<parallel>, #tpu.dimension_semantics<parallel>], iteration_bounds = array<i64: 2, 1>, scalar_prefetch = 0 : i64, scratch_operands = 0 : i64, tpu.core_type = #tpu.core_type<tc>, window_params = [{transform_indices = @transform_0, window_bounds = array<i64: 1, 4, 16, 16>}, {transform_indices = @transform_1, window_bounds = array<i64: 1, 2, 16, 16>}]} {
    %c0 = arith.constant 0 : index
    %c0_0 = arith.constant 0 : index
    %c0_1 = arith.constant 0 : index
    %c0_2 = arith.constant 0 : index
    %0 = vector.load %arg2[%c0, %c0_0, %c0_1, %c0_2] : memref<1x4x16x16xf32, #tpu.memory_space<vmem>>, vector<1x1x16x16xf32>
    %1 = vector.shape_cast %0 : vector<1x1x16x16xf32> to vector<16x16xf32>
    %c1_i32 = arith.constant 1 : i32
    %c0_3 = arith.constant 0 : index
    %2 = arith.index_cast %c1_i32 : i32 to index
    %c0_4 = arith.constant 0 : index
    %c0_5 = arith.constant 0 : index
    %3 = vector.load %arg2[%c0_3, %2, %c0_4, %c0_5] : memref<1x4x16x16xf32, #tpu.memory_space<vmem>>, vector<1x1x16x16xf32>
    %4 = vector.shape_cast %3 : vector<1x1x16x16xf32> to vector<16x16xf32>
    %5 = arith.maximumf %1, %4 : vector<16x16xf32>
    %6 = arith.addf %1, %4 : vector<16x16xf32>
    %c2_i32 = arith.constant 2 : i32
    %c0_6 = arith.constant 0 : index
    %7 = arith.index_cast %c2_i32 : i32 to index
    %c0_7 = arith.constant 0 : index
    %c0_8 = arith.constant 0 : index
    %8 = vector.load %arg2[%c0_6, %7, %c0_7, %c0_8] : memref<1x4x16x16xf32, #tpu.memory_space<vmem>>, vector<1x1x16x16xf32>
    %9 = vector.shape_cast %8 : vector<1x1x16x16xf32> to vector<16x16xf32>
    %10 = arith.maximumf %5, %9 : vector<16x16xf32>
    %11 = arith.addf %6, %9 : vector<16x16xf32>
    %c3_i32 = arith.constant 3 : i32
    %c0_9 = arith.constant 0 : index
    %12 = arith.index_cast %c3_i32 : i32 to index
    %c0_10 = arith.constant 0 : index
    %c0_11 = arith.constant 0 : index
    %13 = vector.load %arg2[%c0_9, %12, %c0_10, %c0_11] : memref<1x4x16x16xf32, #tpu.memory_space<vmem>>, vector<1x1x16x16xf32>
    %14 = vector.shape_cast %13 : vector<1x1x16x16xf32> to vector<16x16xf32>
    %15 = arith.maximumf %10, %14 : vector<16x16xf32>
    %16 = arith.addf %11, %14 : vector<16x16xf32>
    %c3_i32_12 = arith.constant 3 : i32
    %c0_13 = arith.constant 0 : index
    %c0_14 = arith.constant 0 : index
    %c0_15 = arith.constant 0 : index
    %c0_16 = arith.constant 0 : index
    %17 = vector.load %arg3[%c0_13, %c0_14, %c0_15, %c0_16] : memref<1x2x16x16xf32, #tpu.memory_space<vmem>>, vector<1x1x16x16xf32>
    %18 = vector.shape_cast %17 : vector<1x1x16x16xf32> to vector<16x16xf32>
    %19 = vector.shape_cast %15 : vector<16x16xf32> to vector<1x1x16x16xf32>
    tpu.vector_store %arg3[%c0_13, %c0_14, %c0_15, %c0_16], %19 {strides = array<i32>} : memref<1x2x16x16xf32, #tpu.memory_space<vmem>>, vector<1x1x16x16xf32>,
    %cst = arith.constant 2.500000e-01 : f32
    %20 = vector.broadcast %cst : f32 to vector<16x16xf32>
    %21 = arith.mulf %16, %20 : vector<16x16xf32>
    %c0_17 = arith.constant 0 : index
    %c1 = arith.constant 1 : index
    %c0_18 = arith.constant 0 : index
    %c0_19 = arith.constant 0 : index
    %22 = vector.load %arg3[%c0_17, %c1, %c0_18, %c0_19] : memref<1x2x16x16xf32, #tpu.memory_space<vmem>>, vector<1x1x16x16xf32>
    %23 = vector.shape_cast %22 : vector<1x1x16x16xf32> to vector<16x16xf32>
    %24 = vector.shape_cast %21 : vector<16x16xf32> to vector<1x1x16x16xf32>
    tpu.vector_store %arg3[%c0_17, %c1, %c0_18, %c0_19], %24 {strides = array<i32>} : memref<1x2x16x16xf32, #tpu.memory_space<vmem>>, vector<1x1x16x16xf32>,
    return
  }
  func.func @transform_0(%arg0: i32, %arg1: i32) -> (i32, i32, i32, i32) {
    %c0_i32 = arith.constant 0 : i32
    %c0_i32_0 = arith.constant 0 : i32
    %c0_i32_1 = arith.constant 0 : i32
    return %arg0, %c0_i32, %arg1, %c0_i32_0 : i32, i32, i32, i32
  }
  func.func @transform_1(%arg0: i32, %arg1: i32) -> (i32, i32, i32, i32) {
    %c0_i32 = arith.constant 0 : i32
    %c0_i32_0 = arith.constant 0 : i32
    %c0_i32_1 = arith.constant 0 : i32
    return %arg0, %c0_i32, %arg1, %c0_i32_0 : i32, i32, i32, i32
  }
}

</mosaic_0001>

<bundles_post_ra>
// kernel: tpu_custom_call.1
= control target key start
LH: loop header
LB: loop body
LE: loop exit
PB: predicated region body
PF: predicated region fallthrough
CT: control target
= control target key end

     0   :  { %6 = vsyncpa [#allocation3], 0  ;;  %s637_s0 = inlined_call_operand.hbm [shape: f32[2,4,16,16], index: 0, kind: input, shape index: {}]   ;;  %s638_s1 = inlined_call_operand.hbm [shape: f32[2,2,16,16], index: 1, kind: output, shape index: {}]  }
   0x1   :  { %8 = vsyncpa [#allocation3 + $0x1], 0 }
   0x2   :  { %9 = vsyncpa [#allocation4], 0 }
   0x3   :  { %11 = vsyncpa [#allocation4 + $0x1], 0  ;;  %s512_s6 = smov 0   ;;  %s514_s7 = smov 0  }
   0x4   :  { %s516_s8 = smov 0   ;;  %s518_s9 = smov 0  }
   0x5   :  { %s520_s10 = smov 0   ;;  %s522_s11 = smov 0  }
   0x6 LB: > { %s293_s12 = sadd.s32 4294967295, %s496_s11   ;;  %s294_s13 = sadd.s32 4294967294, %s496_s11   ;;  %s496_s11 = sphi %s522_s11, %s17_s11   ;;  %s492_s10 = sphi %s520_s10, %s647_s10   ;;  %s488_s9 = sphi %s518_s9, %s646_s9   ;;  %s484_s8 = sphi %s516_s8, %s645_s8   ;;  %s480_s7 = sphi %s514_s7, %s644_s7   ;;  %s476_s6 = sphi %s512_s6, %s643_s6  }
   0x7   : > { %s29_s14 = sadd.s32 1, %s492_s10  ;;  %s38_s15 = sadd.s32 1, %s484_s8 }
   0x8   : > { %p31_p0 = scmp.ge.s32.totalorder %s29_s14, 2  ;;  %p45_p1 = scmp.ne.s32.totalorder %s484_s8, %s480_s7 }
   0x9   : > { %p46_p2 = scmp.eq.s32.totalorder %s496_s11, 0  ;;  %p51_p3 = scmp.ne.s32.totalorder %s480_s7, %s476_s6 }
   0xa   : > { %s649_s14 = smov (%p31_p0, %s29_s14), 0  ;;  %p52_p5 = scmp.eq.s32.totalorder %s293_s12, 0 }
   0xb   : > { %p553_p4 = por %p46_p2, %p45_p1  ;;  %s33_s17 = ssub.s32 %s492_s10, %s649_s14 }
   0xc   : > { %p77_p6 = scmp.eq.s32.totalorder %s293_s12, 1  ;;  %p36_p7 = scmp.eq.s32.totalorder %s33_s17, 0 }
   0xd   : > { %p559_p8 = por %p52_p5, %p51_p3  ;;  %p83_p10 = scmp.eq.s32.totalorder %s294_s13, 1 }
   0xe   : > { %p563_p9 = por %p77_p6, %p45_p1  ;;  %p296_p12 = scmp.ge.s32.totalorder %s496_s11, 2 }
   0xf   : > { %s568_s20 = scalar_select %p36_p7, %s484_s8, %s38_s15  }
  0x10   : > { %p570_p11 = por %p83_p10, %p51_p3  ;;  %p330_p13 = scmp.lt.s32.totalorder %s496_s11, 2 }
  0x11   : > { %s103_s22 = sand.u32 1, %s484_s8   ;;  %s316_s24 = sshll.u32 %s492_s10, 6 }
  0x12   : > { %s297_s23 = sshll.u32 %s103_s22, 6  ;;  %s114_s27 = scalar_lea.hbm %s637_s0, %s316_s24 }
  0x13   : > { %s107_s28 = scalar_lea.vmem [#allocation2], %s297_s23  ;;  %s115_s30 = sshll.u32 %s114_s27, 4  ;;  %s116_s30 = int_to_ptr.hbm [resolvable:$true] %s115_s30 }
  0x14   : > { %s117_s29 = sshll.u32 %s107_s28, 4  ;;  %p323_p0 = pnand %p330_p13, %p553_p4  ;;  %s118_s29 = int_to_ptr.vmem [resolvable:$true] %s117_s29 }
  0x15   : > { %p300_p1 = scmp.ge.s32.totalorder %s496_s11, 1  ;;  %s104_s2 = scalar_lea.sflag [#allocation3], %s103_s22 }
  0x16   : > { %s498_s3 = smov 128   ;;  %s499_s4 = smov 8  }
  0x17   : > { %325 = dma.hbm_to_vmem [thread:$0]  (!%p323_p0), %s116_s30, 1024, %s118_s29, %s104_s2, %s498_s3, %s498_s3, %s499_s4  }
  0x18   : > { %p125_p2 = scmp.lt.s32.totalorder %s496_s11, 3 }
  0x1a   : > { %p126_p3 = pnand %p300_p1, %p125_p2 }
  0x1b   : > { %s586_s5 = sand.u32 (!%p126_p3), 1, %s480_s7  }
  0x1c   : > { %129 = sbr.rel (%p126_p3) target bundleno = 50 (0x32), region = 24  ;;  %s301_s12 = sshll.u32 (!%p126_p3), %s586_s5, 6 }
  0x1d   : > { %s132_s13 = scalar_lea.sflag (!%p126_p3), [#allocation3], %s586_s5  ;;  %s135_s15 = scalar_lea.vmem (!%p126_p3), [#allocation2], %s301_s12 }
  0x21   : > { %467 = dma.done.wait (%p559_p8), %s132_s13, 1024  }
  0x22   : > { %469 = vsyncadd (%p559_p8), %s132_s13, 4294966272  ;;  %s302_s16 = sshll.u32 %s586_s5, 5  ;;  %s317_s17 = sshll.u32 %s488_s9, 5  ;;  %v157_v0 = vld [vmem:[%s135_s15] sm:$0xff]  ;;  %v303_v1 = vld [vmem:[%s135_s15 + $0x10] sm:$0xff]  ;;  %vm180_vm0 = vcmask 130048  }
  0x23   : > { %v305_v2 = vld [vmem:[%s135_s15 + $0x20] sm:$0xff]  ;;  %v162_v3 = vmax.f32 %v157_v0, %v303_v1  ;;  %v158_v4 = vld [vmem:[%s135_s15 + $0x8] sm:$0xff]  ;;  %v304_v5 = vld [vmem:[%s135_s15 + $0x18] sm:$0xff]  ;;  %v164_v6 = vadd.f32 %v303_v1, %v157_v0  ;;  %s202_s24 = scalar_lea.hbm %s638_s1, %s317_s17  ;;  %s154_s9 = scalar_lea.vmem [#allocation5], %s302_s16 }
  0x24   : > { %v307_v7 = vld [vmem:[%s135_s15 + $0x30] sm:$0xff]  ;;  %v163_v8 = vmax.f32 %v158_v4, %v304_v5  ;;  %v306_v9 = vld [vmem:[%s135_s15 + $0x28] sm:$0xff]  ;;  %v165_v10 = vadd.f32 %v304_v5, %v158_v4  ;;  %v308_v12 = vld [vmem:[%s135_s15 + $0x38] sm:$0xff]  ;;  %s203_s18 = sshll.u32 %s154_s9, 4  ;;  %s205_s25 = sshll.u32 %s202_s24, 4  ;;  %s204_s18 = int_to_ptr.vmem [resolvable:$true] %s203_s18  ;;  %s206_s25 = int_to_ptr.hbm [resolvable:$true] %s205_s25 }
  0x25   : > { %v169_v11 = vmax.f32 %v162_v3, %v305_v2  ;;  %v171_v13 = vadd.f32 %v305_v2, %v164_v6  ;;  %s189_s26 = scalar_lea.sflag [#allocation4], %s586_s5  ;;  %s428_s27 = sshra.s32 %s206_s25, 4  ;;  %s429_s27 = int_to_ptr.hbm [resolvable:$true] %s428_s27 }
  0x26   : > { %v170_v14 = vmax.f32 %v163_v8, %v306_v9  ;;  %v172_v15 = vadd.f32 %v306_v9, %v165_v10  ;;  %s430_s28 = scalar_lea.hbm %s429_s27, 32  ;;  %s434_s2 = scalar_lea.hbm %s638_s1, 64 }
  0x27   : > { %v176_v16 = vmax.f32 %v169_v11, %v307_v7  ;;  %v178_v17 = vadd.f32 %v307_v7, %v171_v13  ;;  %p431_p4 = scmp.ne.s32.totalorder %s429_s27, %s430_s28  ;;  %p435_p7 = scmp.lt.s32.totalorder %s429_s27, %s638_s1 }
  0x28   : > { %v177_v18 = vmax.f32 %v170_v14, %v308_v12  ;;  %v179_v19 = vadd.f32 %v308_v12, %v172_v15  ;;  %p436_p8 = scmp.lt.s32.totalorder %s434_s2, %s430_s28 }
  0x29   : > { %181 = vst.msk [vmem:[%s154_s9] sm:$0xff] %vm180_vm0, %v176_v16  ;;  %v183_v20 = vmul.f32 0.25, %v178_v17  ;;  %p432_p5 = pnand %p431_p4, %p563_p9 }
  0x2a   : > { %182 = vst.msk [vmem:[%s154_s9 + $0x8] sm:$0xff] %vm180_vm0, %v177_v18  ;;  %v184_v21 = vmul.f32 0.25, %v179_v19  ;;  %p437_p10 = por %p436_p8, %p435_p7 }
  0x2b   : > { %309 = vst.msk [vmem:[%s154_s9 + $0x10] sm:$0xff] %vm180_vm0, %v183_v20  ;;  %p433_p6 = pneg %p432_p5 }
  0x2c   : > { %310 = vst.msk [vmem:[%s154_s9 + $0x18] sm:$0xff] %vm180_vm0, %v184_v21 }
  0x2d   : > { %p438_p13 = pnand %p437_p10, %p433_p6 }
  0x2f   : > { %441 = shalt.err (!%p438_p13)
}
  0x30   : > { %s500_s5 = smov 128   ;;  %s501_s12 = smov 8  }
  0x31   : > { %320 = dma.vmem_to_hbm [thread:$0]  (%p563_p9), %s204_s18, 512, %s206_s25, %s189_s26, %s500_s5, %s500_s5, %s501_s12  }
  0x32 PF: > { %s220_s13 = sand.u32 1, %s476_s6   ;;  %p327_p0 = pnand %p296_p12, %p570_p11 }
  0x33   : > { %s221_s15 = scalar_lea.sflag [#allocation4], %s220_s13 }
  0x34   : > { %p328_p1 = pneg %p327_p0 }
  0x36   : > { %471 = dma.done.wait (%p328_p1), %s221_s15, 512  }
  0x37   : > { %473 = vsyncadd (%p328_p1), %s221_s15, 4294966784  ;;  %s17_s11 = sadd.s32 1, %s496_s11   ;;  %s643_s6 = smov %s480_s7 }
  0x38   : > { %p14_p2 = scmp.ge.s32.totalorder %s17_s11, 4   ;;  %s644_s7 = smov %s484_s8 }
  0x39   : > { %s645_s8 = smov %s568_s20  ;;  %s646_s9 = smov %s492_s10 }
  0x3a   : > { %s647_s10 = smov %s649_s14  ;;  %16 = sbr.rel (!%p14_p2) target bundleno = 6 (0x6), region = 73 }
  0x3f   :  { %227 = vsyncpa [#allocation3], 1 }
  0x40   :  { %229 = vsyncpa [#allocation3 + $0x1], 1 }
  0x41   :  { %230 = vsyncpa [#allocation4], 1 }
  0x42   :  { %232 = vsyncpa [#allocation4 + $0x1], 1 }

</bundles_post_ra>
